<compile_context>
chip_gen: v5e
topology: v5e:2x2
jax: 0.10.0
libtpu: 0.0.40
codegen_flags: <defaults>
</compile_context>

<pallas_src>
import math

import numpy as np
import jax
import jax.numpy as jnp
from jax.experimental import pallas as pl
from jax.experimental.pallas import tpu as pltpu

MASKED = -1024.0  # stand-in for kwja.utils.constants.MASKED


# ----------------------------------------------------------------------------
# Pallas kernel: forward-algorithm log-partition (denominator) recurrence,
# gold-path reduction and llh = denominator - numerator for one batch block.
# ----------------------------------------------------------------------------
def _crf_block_kernel(lo_ref, hi_ref,                       # scalar prefetch (SMEM)
                      em_ref, mask_ref, gold_ref, edge_ref,  # (T,K,Bb)/(T,Bb)/(T,Bb)/(1,Bb)
                      start_ref, etr_ref, tmax_ref, end_ref, # (K,1)/(K,K)/(K,1)/(K,1)
                      out_ref):                              # (1,1,Bb)
    T, K, Bb = em_ref.shape
    blk = pl.program_id(0)

    # ---- loop-invariant loads / hoisted broadcasts -------------------------
    start_b = jnp.broadcast_to(start_ref[...], (K, Bb))     # (K,Bb)
    end_col = end_ref[...]                                   # (K,1)
    tmax_col = tmax_ref[...]                                 # (K,1)  max_src trans[:,d]
    etr = etr_ref[...]                                       # (K,K)  exp(trans[s,d]-tmax[d])

    mask_all = mask_ref[...]                                 # (T,Bb) i32
    t_iota = jax.lax.broadcasted_iota(jnp.int32, (T, Bb), 0)
    head_row = jnp.min(jnp.where(mask_all != 0, t_iota, T - 1),
                       axis=0, keepdims=True)                # (1,Bb)
    nonempty = jnp.sum(mask_all, axis=0, keepdims=True) > 0  # (1,Bb)

    # ---- numerator: pre-gathered gold rows, one reduction, no recurrence ----
    numer = jnp.sum(gold_ref[...], axis=0, keepdims=True) + edge_ref[...]   # (1,Bb)

    tiny = jnp.float32(1e-37)

    # ---- vectorized forward recurrence over timesteps (denominator) --------
    def body(t, den):                                        # den: (K,Bb) f32
        em_j = em_ref[t]                                     # (K,Bb) dynamic row load
        mask_j = mask_ref[pl.ds(t, 1), :]                    # (1,Bb)
        is_head = head_row == t                              # (1,Bb)
        in_seq = jnp.logical_and(mask_j != 0, jnp.logical_not(is_head))

        # Shared-max logsumexp over source tags:
        #   lse[d] = m + tmax[d] + log( sum_s exp(den[s]-m) * exp(trans[s,d]-tmax[d]) )
        m = jnp.max(den, axis=0, keepdims=True)              # single XLU max
        p = jnp.exp(den - m)                                 # single EUP exp (K,Bb)
        rows = [jnp.sum(p * etr[:, d:d + 1], axis=0, keepdims=True)
                for d in range(K)]                           # K tiny, static unroll
        s = jnp.concatenate(rows, axis=0)                    # (K,Bb)
        lse = m + tmax_col + jnp.log(jnp.maximum(s, tiny))

        return jnp.where(is_head, start_b + em_j,
                         jnp.where(in_seq, lse + em_j, den))

    den0 = jnp.zeros((K, Bb), jnp.float32)
    den = jax.lax.fori_loop(lo_ref[blk], hi_ref[blk], body, den0)

    # ---- finalize -----------------------------------------------------------
    dtot = den + end_col                                     # (K,Bb)
    dm = jnp.max(dtot, axis=0, keepdims=True)
    denom = dm + jnp.log(jnp.sum(jnp.exp(dtot - dm), axis=0, keepdims=True))

    out_ref[...] = jnp.where(nonempty, denom - numer, 0.0).reshape(1, 1, Bb)


# ----------------------------------------------------------------------------
# Wrapper
# ----------------------------------------------------------------------------
def crf_llh_pallas(emissions, tags, mask, start, trans, end, lane_block=128):
    """Per-sequence negative log-likelihood (denominator - numerator)."""
    B, T, K = emissions.shape
    em = emissions.astype(jnp.float32)
    tags_i = tags.astype(jnp.int32)
    mask_i = mask.astype(jnp.int32)
    start_f = start.astype(jnp.float32)
    trans_f = trans.astype(jnp.float32)
    end_f = end.astype(jnp.float32)

    ar = jnp.arange(T)
    bidx = jnp.arange(B)
    heads = jnp.min(jnp.where(mask_i != 0, ar[None, :], T - 1), axis=1)   # (B,)
    tails = jnp.max(ar[None, :] * mask_i, axis=1)                         # (B,)
    head_tags = tags_i[bidx, heads]
    tail_tags = tags_i[bidx, tails]

    # Gold-path gathers (tiny, O(B*T)) done with plain XLA; the kernel only
    # sums these lane-major rows (per-lane K-gathers map poorly to TPU lanes).
    em_gold = jnp.take_along_axis(em, tags_i[:, :, None], axis=2)[..., 0]  # (B,T)
    trans_prev = trans_f[tags_i[:, :-1], tags_i[:, 1:]]                    # (B,T-1)
    trans_gold = jnp.concatenate(
        [jnp.zeros((B, 1), jnp.float32), trans_prev], axis=1)              # (B,T)
    trans_gold = jnp.where(ar[None, :] == heads[:, None], 0.0, trans_gold)
    gold = jnp.where(mask_i != 0, em_gold + trans_gold, 0.0)               # (B,T)
    edge = (start_f[head_tags] + end_f[tail_tags]).reshape(1, B)           # (1,B)

    # Column-shifted exp(transitions) for the shared-max logsumexp.
    tmax = jnp.max(trans_f, axis=0)                                        # (K,)
    etr = jnp.exp(trans_f - tmax[None, :])                                 # (K,K)

    Bb = lane_block
    nblk = -(-B // Bb)
    B_pad = nblk * Bb
    pad = B_pad - B

    # lane-major layout: time/tags on sublanes, batch on lanes (128-aligned)
    em_t = jnp.transpose(em, (1, 2, 0))                                    # (T,K,B)
    mask_t = mask_i.T                                                      # (T,B)
    gold_t = gold.T                                                        # (T,B)
    if pad:
        em_t = jnp.pad(em_t, ((0, 0), (0, 0), (0, pad)))
        mask_t = jnp.pad(mask_t, ((0, 0), (0, pad)))
        gold_t = jnp.pad(gold_t, ((0, 0), (0, pad)))
        edge = jnp.pad(edge, ((0, 0), (0, pad)))
        heads = jnp.pad(heads, (0, pad), constant_values=T - 1)
        tails = jnp.pad(tails, (0, pad))

    # Per-block dynamic loop bounds [min_head, max_tail + 1), prefetched to SMEM
    lo = jnp.min(heads.reshape(nblk, Bb), axis=1).astype(jnp.int32)
    hi = (jnp.max(tails.reshape(nblk, Bb), axis=1) + 1).astype(jnp.int32)

    grid_spec = pltpu.PrefetchScalarGridSpec(
        num_scalar_prefetch=2,
        grid=(nblk,),
        in_specs=[
            pl.BlockSpec((T, K, Bb), lambda b, lo_r, hi_r: (0, 0, b)),
            pl.BlockSpec((T, Bb), lambda b, lo_r, hi_r: (0, b)),
            pl.BlockSpec((T, Bb), lambda b, lo_r, hi_r: (0, b)),
            pl.BlockSpec((1, Bb), lambda b, lo_r, hi_r: (0, b)),
            pl.BlockSpec((K, 1), lambda b, lo_r, hi_r: (0, 0)),
            pl.BlockSpec((K, K), lambda b, lo_r, hi_r: (0, 0)),
            pl.BlockSpec((K, 1), lambda b, lo_r, hi_r: (0, 0)),
            pl.BlockSpec((K, 1), lambda b, lo_r, hi_r: (0, 0)),
        ],
        out_specs=pl.BlockSpec((1, 1, Bb), lambda b, lo_r, hi_r: (b, 0, 0)),
    )

    llh = pl.pallas_call(
        _crf_block_kernel,
        out_shape=jax.ShapeDtypeStruct((nblk, 1, Bb), jnp.float32),
        grid_spec=grid_spec,
        compiler_params=pltpu.CompilerParams(
            dimension_semantics=("parallel",)),
    )(lo, hi, em_t, mask_t, gold_t, edge,
      start_f.reshape(K, 1), etr, tmax.reshape(K, 1), end_f.reshape(K, 1))
    return llh.reshape(B_pad)[:B]


def crf_forward(emissions, tags, mask, start, trans, end,
                reduction="token_mean"):
    llh = crf_llh_pallas(emissions, tags, mask, start, trans, end)
    if reduction == "none":
        return llh
    if reduction == "sum":
        return llh.sum()
    if reduction == "mean":
        return llh.mean()
    # token_mean (default)
    labels_in_batch = mask.astype(jnp.int32).sum(axis=1).astype(jnp.float32)
    eps = 1e-6
    return (llh / (labels_in_batch + eps)).sum() / (
        (labels_in_batch != 0).sum() + eps)


# ----------------------------------------------------------------------------
# Pure-JAX reference (direct port of the torch code) for a correctness check.
# ----------------------------------------------------------------------------
def crf_llh_ref(emissions, tags, mask, start, trans, end):
    B, T, K = emissions.shape
    ar = jnp.arange(T)
    bidx = jnp.arange(B)
    maskb = mask.astype(bool)
    head = jnp.min(jnp.where(maskb, ar, T - 1), axis=1)
    tail = jnp.max(ar * maskb.astype(jnp.int32), axis=1)
    head_tags = tags[bidx, head]
    tail_tags = tags[bidx, tail]

    score = start[head_tags] + emissions[bidx, head, head_tags]
    for j in range(1, T):
        cond = maskb[:, j] & (head != j)
        nxt = (score + trans[tags[:, j - 1], tags[:, j]]
               + emissions[bidx, j, tags[:, j]])
        score = jnp.where(cond, nxt, score)
    numer = jnp.where(maskb.sum(1) != 0, score + end[tail_tags], 0.0)

    sc = start[None, :] + emissions[bidx, head]
    for j in range(1, T):
        cond = maskb[:, j] & (head != j)
        nxt = jax.scipy.special.logsumexp(
            sc[:, :, None] + trans[None, :, :] + emissions[:, j][:, None, :],
            axis=1)
        sc = jnp.where(cond[:, None], nxt, sc)
    den = jax.scipy.special.logsumexp(sc + end[None, :], axis=1)
    den = jnp.where(maskb.sum(1) != 0, den, 0.0)
    return den - numer


# ----------------------------------------------------------------------------
# Deterministic parameter construction (mirrors CRF.__init__)
# ----------------------------------------------------------------------------
def make_crf_params(tag_names, key):
    K = len(tag_names)
    bound = math.sqrt(6.0 / K)
    k1, k2, k3 = jax.random.split(key, 3)
    start = np.array(jax.random.uniform(k1, (K,), minval=-bound, maxval=bound))
    trans = np.array(jax.random.uniform(k2, (K, K), minval=-bound, maxval=bound))
    end = np.array(jax.random.uniform(k3, (K,), minval=-bound, maxval=bound))
    for i, src in enumerate(tag_names):
        if src.startswith("I-"):
            start[i] = MASKED
        for j, tgt in enumerate(tag_names):
            if ((src.startswith("B-") or src.startswith("I-"))
                    and tgt.startswith("I-") and src[2:] != tgt[2:]):
                trans[i, j] = MASKED
            elif src == "O" and tgt.startswith("I-"):
                trans[i, j] = MASKED
    return (jnp.asarray(start, jnp.float32),
            jnp.asarray(trans, jnp.float32),
            jnp.asarray(end, jnp.float32))


if __name__ == "__main__":
    tag_names = ("O", "B-PER", "I-PER", "B-ORG", "I-ORG",
                 "B-LOC", "I-LOC", "B-MISC", "I-MISC")
    K = len(tag_names)
    key = jax.random.PRNGKey(0)
    kp, ke, kt, ke2, kt2, kl, ko = jax.random.split(key, 7)
    start, trans, end = make_crf_params(tag_names, kp)

    # --- case 1: small batch with tricky masks ------------------------------
    B, T = 4, 10
    emissions = jax.random.normal(ke, (B, T, K), dtype=jnp.float32)
    tags = jax.random.randint(kt, (B, T), 0, K, dtype=jnp.int32)
    mask = jnp.array([
        [1, 1, 1, 1, 1, 1, 1, 1, 1, 1],   # full sequence
        [0, 0, 1, 1, 1, 1, 1, 1, 0, 0],   # padded on both sides
        [1, 1, 1, 0, 1, 1, 0, 1, 1, 0],   # holes inside the sequence
        [0, 0, 0, 0, 0, 0, 0, 0, 0, 0],   # empty sequence
    ], dtype=bool)

    llh_kernel = jax.block_until_ready(
        crf_llh_pallas(emissions, tags, mask, start, trans, end))
    llh_ref = jax.block_until_ready(
        crf_llh_ref(emissions, tags, mask, start, trans, end))
    np.testing.assert_allclose(np.asarray(llh_kernel), np.asarray(llh_ref),
                               rtol=1e-4, atol=1e-4)

    # --- case 2: multi-block batch (two 128-lane blocks) ---------------------
    B2, T2 = 200, 16
    em2 = jax.random.normal(ke2, (B2, T2, K), dtype=jnp.float32)
    tg2 = jax.random.randint(kt2, (B2, T2), 0, K, dtype=jnp.int32)
    lens = jax.random.randint(kl, (B2,), 0, T2 + 1)
    offs = jax.random.randint(ko, (B2,), 0, T2)
    ar2 = jnp.arange(T2)
    mk2 = ((ar2[None, :] >= offs[:, None])
           & (ar2[None, :] < offs[:, None] + lens[:, None]))
    llh2 = jax.block_until_ready(crf_llh_pallas(em2, tg2, mk2, start, trans, end))
    ref2 = jax.block_until_ready(crf_llh_ref(em2, tg2, mk2, start, trans, end))
    np.testing.assert_allclose(np.asarray(llh2), np.asarray(ref2),
                               rtol=1e-4, atol=2e-4)

    loss = jax.block_until_ready(
        crf_forward(emissions, tags, mask, start, trans, end,
                    reduction="token_mean"))
    assert np.isfinite(float(loss))

    print("KERNEL_OK")
</pallas_src>

<mosaic_0001>
module attributes {stable_mosaic.version = 11 : i64} {
  func.func @_crf_block_kernel(%arg0: i32, %arg1: memref<1xi32, #tpu.memory_space<smem>>, %arg2: memref<1xi32, #tpu.memory_space<smem>>, %arg3: memref<10x9x128xf32, #tpu.memory_space<vmem>>, %arg4: memref<10x128xi32, #tpu.memory_space<vmem>>, %arg5: memref<10x128xf32, #tpu.memory_space<vmem>>, %arg6: memref<1x128xf32, #tpu.memory_space<vmem>>, %arg7: memref<9x1xf32, #tpu.memory_space<vmem>>, %arg8: memref<9x9xf32, #tpu.memory_space<vmem>>, %arg9: memref<9x1xf32, #tpu.memory_space<vmem>>, %arg10: memref<9x1xf32, #tpu.memory_space<vmem>>, %arg11: memref<1x1x128xf32, #tpu.memory_space<vmem>>) attributes {dimension_semantics = [#tpu.dimension_semantics<parallel>], iteration_bounds = array<i64: 1>, scalar_prefetch = 2 : i64, scratch_operands = 0 : i64, tpu.core_type = #tpu.core_type<tc>, window_params = [{transform_indices = @transform_0, window_bounds = array<i64: 10, 9, 128>}, {transform_indices = @transform_1, window_bounds = array<i64: 10, 128>}, {transform_indices = @transform_2, window_bounds = array<i64: 10, 128>}, {transform_indices = @transform_3, window_bounds = array<i64: 1, 128>}, {pipeline_mode = #tpu.pipeline_mode<synchronous>, transform_indices = @transform_4, window_bounds = array<i64: 9, 1>}, {pipeline_mode = #tpu.pipeline_mode<synchronous>, transform_indices = @transform_5, window_bounds = array<i64: 9, 9>}, {pipeline_mode = #tpu.pipeline_mode<synchronous>, transform_indices = @transform_6, window_bounds = array<i64: 9, 1>}, {pipeline_mode = #tpu.pipeline_mode<synchronous>, transform_indices = @transform_7, window_bounds = array<i64: 9, 1>}, {transform_indices = @transform_8, window_bounds = array<i64: 1, 1, 128>}]} {
    %c0 = arith.constant 0 : index
    %c0_0 = arith.constant 0 : index
    %0 = vector.load %arg7[%c0, %c0_0] : memref<9x1xf32, #tpu.memory_space<vmem>>, vector<9x1xf32>
    %1 = vector.shape_cast %0 : vector<9x1xf32> to vector<9x1xf32>
    %2 = vector.broadcast %1 : vector<9x1xf32> to vector<9x128xf32>
    %c0_1 = arith.constant 0 : index
    %c0_2 = arith.constant 0 : index
    %3 = vector.load %arg10[%c0_1, %c0_2] : memref<9x1xf32, #tpu.memory_space<vmem>>, vector<9x1xf32>
    %c0_3 = arith.constant 0 : index
    %c0_4 = arith.constant 0 : index
    %4 = vector.load %arg9[%c0_3, %c0_4] : memref<9x1xf32, #tpu.memory_space<vmem>>, vector<9x1xf32>
    %c0_5 = arith.constant 0 : index
    %c0_6 = arith.constant 0 : index
    %5 = vector.load %arg8[%c0_5, %c0_6] : memref<9x9xf32, #tpu.memory_space<vmem>>, vector<9x9xf32>
    %c0_7 = arith.constant 0 : index
    %c0_8 = arith.constant 0 : index
    %6 = vector.load %arg4[%c0_7, %c0_8] : memref<10x128xi32, #tpu.memory_space<vmem>>, vector<10x128xi32>
    %7 = tpu.iota {dimensions = array<i32: 0>} : vector<10x128xi32>
    %c0_i32 = arith.constant 0 : i32
    %8 = vector.broadcast %c0_i32 : i32 to vector<10x128xi32>
    %9 = arith.cmpi ne, %6, %8 : vector<10x128xi32>
    %c9_i32 = arith.constant 9 : i32
    %10 = vector.broadcast %c9_i32 : i32 to vector<10x128xi32>
    %11 = arith.select %9, %7, %10 : vector<10x128xi1>, vector<10x128xi32>
    %cst = arith.constant dense<2147483647> : vector<128xi32>
    %12 = vector.multi_reduction <minsi>, %11, %cst [0] : vector<10x128xi32> to vector<128xi32>
    %13 = vector.shape_cast %12 : vector<128xi32> to vector<1x128xi32>
    %cst_9 = arith.constant dense<0> : vector<128xi32>
    %14 = vector.multi_reduction <add>, %6, %cst_9 [0] : vector<10x128xi32> to vector<128xi32>
    %15 = vector.shape_cast %14 : vector<128xi32> to vector<1x128xi32>
    %c0_i32_10 = arith.constant 0 : i32
    %16 = vector.broadcast %c0_i32_10 : i32 to vector<1x128xi32>
    %17 = arith.cmpi sgt, %15, %16 : vector<1x128xi32>
    %c0_11 = arith.constant 0 : index
    %c0_12 = arith.constant 0 : index
    %18 = vector.load %arg5[%c0_11, %c0_12] : memref<10x128xf32, #tpu.memory_space<vmem>>, vector<10x128xf32>
    %cst_13 = arith.constant dense<0.000000e+00> : vector<128xf32>
    %19 = vector.multi_reduction <add>, %18, %cst_13 [0] : vector<10x128xf32> to vector<128xf32>
    %20 = vector.shape_cast %19 : vector<128xf32> to vector<1x128xf32>
    %c0_14 = arith.constant 0 : index
    %c0_15 = arith.constant 0 : index
    %21 = vector.load %arg6[%c0_14, %c0_15] : memref<1x128xf32, #tpu.memory_space<vmem>>, vector<1x128xf32>
    %22 = arith.addf %20, %21 : vector<1x128xf32>
    %cst_16 = arith.constant 0.000000e+00 : f32
    %23 = vector.broadcast %cst_16 : f32 to vector<9x128xf32>
    %24 = arith.index_cast %arg0 : i32 to index
    %25 = memref.load %arg1[%24] : memref<1xi32, #tpu.memory_space<smem>>
    %26 = arith.index_cast %arg0 : i32 to index
    %27 = memref.load %arg2[%26] : memref<1xi32, #tpu.memory_space<smem>>
    %cst_17 = arith.constant 9.99999991E-38 : f32
    %28 = arith.subi %27, %25 : i32
    %29 = arith.addi %25, %28 : i32
    %c1_i32 = arith.constant 1 : i32
    %30 = scf.for %arg12 = %25 to %29 step %c1_i32 iter_args(%arg13 = %23) -> (vector<9x128xf32>)  : i32 {
      %47 = arith.index_cast %arg12 : i32 to index
      %c0_24 = arith.constant 0 : index
      %c0_25 = arith.constant 0 : index
      %48 = vector.load %arg3[%47, %c0_24, %c0_25] : memref<10x9x128xf32, #tpu.memory_space<vmem>>, vector<1x9x128xf32>
      %49 = vector.shape_cast %48 : vector<1x9x128xf32> to vector<9x128xf32>
      %50 = arith.index_cast %arg12 : i32 to index
      %c0_26 = arith.constant 0 : index
      %51 = vector.load %arg4[%50, %c0_26] : memref<10x128xi32, #tpu.memory_space<vmem>>, vector<1x128xi32>
      %52 = vector.broadcast %arg12 : i32 to vector<1x128xi32>
      %53 = arith.cmpi eq, %13, %52 : vector<1x128xi32>
      %c0_i32_27 = arith.constant 0 : i32
      %54 = vector.broadcast %c0_i32_27 : i32 to vector<1x128xi32>
      %55 = arith.cmpi ne, %51, %54 : vector<1x128xi32>
      %cst_28 = arith.constant dense<true> : vector<1x128xi1>
      %56 = arith.xori %53, %cst_28 : vector<1x128xi1>
      %57 = arith.andi %55, %56 : vector<1x128xi1>
      %cst_29 = arith.constant dense<0xFF800000> : vector<128xf32>
      %58 = vector.multi_reduction <maximumf>, %arg13, %cst_29 [0] : vector<9x128xf32> to vector<128xf32>
      %59 = vector.shape_cast %58 : vector<128xf32> to vector<1x128xf32>
      %60 = vector.broadcast %59 : vector<1x128xf32> to vector<9x128xf32>
      %61 = arith.subf %arg13, %60 : vector<9x128xf32>
      %62 = math.exp %61 : vector<9x128xf32>
      %63 = vector.extract_strided_slice %5 {offsets = [0, 0], sizes = [9, 1], strides = [1, 1]} : vector<9x9xf32> to vector<9x1xf32>
      %64 = vector.broadcast %63 : vector<9x1xf32> to vector<9x128xf32>
      %65 = arith.mulf %62, %64 : vector<9x128xf32>
      %cst_30 = arith.constant dense<0.000000e+00> : vector<128xf32>
      %66 = vector.multi_reduction <add>, %65, %cst_30 [0] : vector<9x128xf32> to vector<128xf32>
      %67 = vector.shape_cast %66 : vector<128xf32> to vector<1x128xf32>
      %68 = vector.extract_strided_slice %5 {offsets = [0, 1], sizes = [9, 1], strides = [1, 1]} : vector<9x9xf32> to vector<9x1xf32>
      %69 = vector.broadcast %68 : vector<9x1xf32> to vector<9x128xf32>
      %70 = arith.mulf %62, %69 : vector<9x128xf32>
      %cst_31 = arith.constant dense<0.000000e+00> : vector<128xf32>
      %71 = vector.multi_reduction <add>, %70, %cst_31 [0] : vector<9x128xf32> to vector<128xf32>
      %72 = vector.shape_cast %71 : vector<128xf32> to vector<1x128xf32>
      %73 = vector.extract_strided_slice %5 {offsets = [0, 2], sizes = [9, 1], strides = [1, 1]} : vector<9x9xf32> to vector<9x1xf32>
      %74 = vector.broadcast %73 : vector<9x1xf32> to vector<9x128xf32>
      %75 = arith.mulf %62, %74 : vector<9x128xf32>
      %cst_32 = arith.constant dense<0.000000e+00> : vector<128xf32>
      %76 = vector.multi_reduction <add>, %75, %cst_32 [0] : vector<9x128xf32> to vector<128xf32>
      %77 = vector.shape_cast %76 : vector<128xf32> to vector<1x128xf32>
      %78 = vector.extract_strided_slice %5 {offsets = [0, 3], sizes = [9, 1], strides = [1, 1]} : vector<9x9xf32> to vector<9x1xf32>
      %79 = vector.broadcast %78 : vector<9x1xf32> to vector<9x128xf32>
      %80 = arith.mulf %62, %79 : vector<9x128xf32>
      %cst_33 = arith.constant dense<0.000000e+00> : vector<128xf32>
      %81 = vector.multi_reduction <add>, %80, %cst_33 [0] : vector<9x128xf32> to vector<128xf32>
      %82 = vector.shape_cast %81 : vector<128xf32> to vector<1x128xf32>
      %83 = vector.extract_strided_slice %5 {offsets = [0, 4], sizes = [9, 1], strides = [1, 1]} : vector<9x9xf32> to vector<9x1xf32>
      %84 = vector.broadcast %83 : vector<9x1xf32> to vector<9x128xf32>
      %85 = arith.mulf %62, %84 : vector<9x128xf32>
      %cst_34 = arith.constant dense<0.000000e+00> : vector<128xf32>
      %86 = vector.multi_reduction <add>, %85, %cst_34 [0] : vector<9x128xf32> to vector<128xf32>
      %87 = vector.shape_cast %86 : vector<128xf32> to vector<1x128xf32>
      %88 = vector.extract_strided_slice %5 {offsets = [0, 5], sizes = [9, 1], strides = [1, 1]} : vector<9x9xf32> to vector<9x1xf32>
      %89 = vector.broadcast %88 : vector<9x1xf32> to vector<9x128xf32>
      %90 = arith.mulf %62, %89 : vector<9x128xf32>
      %cst_35 = arith.constant dense<0.000000e+00> : vector<128xf32>
      %91 = vector.multi_reduction <add>, %90, %cst_35 [0] : vector<9x128xf32> to vector<128xf32>
      %92 = vector.shape_cast %91 : vector<128xf32> to vector<1x128xf32>
      %93 = vector.extract_strided_slice %5 {offsets = [0, 6], sizes = [9, 1], strides = [1, 1]} : vector<9x9xf32> to vector<9x1xf32>
      %94 = vector.broadcast %93 : vector<9x1xf32> to vector<9x128xf32>
      %95 = arith.mulf %62, %94 : vector<9x128xf32>
      %cst_36 = arith.constant dense<0.000000e+00> : vector<128xf32>
      %96 = vector.multi_reduction <add>, %95, %cst_36 [0] : vector<9x128xf32> to vector<128xf32>
      %97 = vector.shape_cast %96 : vector<128xf32> to vector<1x128xf32>
      %98 = vector.extract_strided_slice %5 {offsets = [0, 7], sizes = [9, 1], strides = [1, 1]} : vector<9x9xf32> to vector<9x1xf32>
      %99 = vector.broadcast %98 : vector<9x1xf32> to vector<9x128xf32>
      %100 = arith.mulf %62, %99 : vector<9x128xf32>
      %cst_37 = arith.constant dense<0.000000e+00> : vector<128xf32>
      %101 = vector.multi_reduction <add>, %100, %cst_37 [0] : vector<9x128xf32> to vector<128xf32>
      %102 = vector.shape_cast %101 : vector<128xf32> to vector<1x128xf32>
      %103 = vector.extract_strided_slice %5 {offsets = [0, 8], sizes = [9, 1], strides = [1, 1]} : vector<9x9xf32> to vector<9x1xf32>
      %104 = vector.broadcast %103 : vector<9x1xf32> to vector<9x128xf32>
      %105 = arith.mulf %62, %104 : vector<9x128xf32>
      %cst_38 = arith.constant dense<0.000000e+00> : vector<128xf32>
      %106 = vector.multi_reduction <add>, %105, %cst_38 [0] : vector<9x128xf32> to vector<128xf32>
      %107 = vector.shape_cast %106 : vector<128xf32> to vector<1x128xf32>
      %108 = tpu.concatenate %67, %72, %77, %82, %87, %92, %97, %102, %107 in 0 : vector<1x128xf32>, vector<1x128xf32>, vector<1x128xf32>, vector<1x128xf32>, vector<1x128xf32>, vector<1x128xf32>, vector<1x128xf32>, vector<1x128xf32>, vector<1x128xf32> -> vector<9x128xf32>
      %109 = vector.broadcast %59 : vector<1x128xf32> to vector<9x128xf32>
      %110 = vector.broadcast %4 : vector<9x1xf32> to vector<9x128xf32>
      %111 = arith.addf %109, %110 : vector<9x128xf32>
      %112 = vector.broadcast %cst_17 : f32 to vector<9x128xf32>
      %113 = arith.maximumf %108, %112 : vector<9x128xf32>
      %114 = math.log %113 : vector<9x128xf32>
      %115 = arith.addf %111, %114 : vector<9x128xf32>
      %116 = arith.addf %2, %49 : vector<9x128xf32>
      %117 = arith.addf %115, %49 : vector<9x128xf32>
      %118 = vector.shape_cast %57 : vector<1x128xi1> to vector<1x128xi1>
      %119 = vector.broadcast %118 : vector<1x128xi1> to vector<9x128xi1>
      %120 = arith.select %119, %117, %arg13 : vector<9x128xi1>, vector<9x128xf32>
      %121 = vector.shape_cast %53 : vector<1x128xi1> to vector<1x128xi1>
      %122 = vector.broadcast %121 : vector<1x128xi1> to vector<9x128xi1>
      %123 = arith.select %122, %116, %120 : vector<9x128xi1>, vector<9x128xf32>
      scf.yield %123 : vector<9x128xf32>
    }
    %31 = vector.broadcast %3 : vector<9x1xf32> to vector<9x128xf32>
    %32 = arith.addf %30, %31 : vector<9x128xf32>
    %cst_18 = arith.constant dense<0xFF800000> : vector<128xf32>
    %33 = vector.multi_reduction <maximumf>, %32, %cst_18 [0] : vector<9x128xf32> to vector<128xf32>
    %34 = vector.shape_cast %33 : vector<128xf32> to vector<1x128xf32>
    %35 = vector.broadcast %34 : vector<1x128xf32> to vector<9x128xf32>
    %36 = arith.subf %32, %35 : vector<9x128xf32>
    %37 = math.exp %36 : vector<9x128xf32>
    %cst_19 = arith.constant dense<0.000000e+00> : vector<128xf32>
    %38 = vector.multi_reduction <add>, %37, %cst_19 [0] : vector<9x128xf32> to vector<128xf32>
    %39 = vector.shape_cast %38 : vector<128xf32> to vector<1x128xf32>
    %40 = math.log %39 : vector<1x128xf32>
    %41 = arith.addf %34, %40 : vector<1x128xf32>
    %42 = arith.subf %41, %22 : vector<1x128xf32>
    %cst_20 = arith.constant 0.000000e+00 : f32
    %43 = vector.broadcast %cst_20 : f32 to vector<1x128xf32>
    %44 = arith.select %17, %42, %43 : vector<1x128xi1>, vector<1x128xf32>
    %45 = vector.shape_cast %44 : vector<1x128xf32> to vector<1x1x128xf32>
    %c0_21 = arith.constant 0 : index
    %c0_22 = arith.constant 0 : index
    %c0_23 = arith.constant 0 : index
    %46 = vector.load %arg11[%c0_21, %c0_22, %c0_23] : memref<1x1x128xf32, #tpu.memory_space<vmem>>, vector<1x1x128xf32>
    tpu.vector_store %arg11[%c0_21, %c0_22, %c0_23], %45 {strides = array<i32>} : memref<1x1x128xf32, #tpu.memory_space<vmem>>, vector<1x1x128xf32>,
    return
  }
  func.func @transform_0(%arg0: i32, %arg1: memref<1xi32, #tpu.memory_space<smem>>, %arg2: memref<1xi32, #tpu.memory_space<smem>>) -> (i32, i32, i32) {
    %c0_i32 = arith.constant 0 : i32
    %c0_i32_0 = arith.constant 0 : i32
    %c0_i32_1 = arith.constant 0 : i32
    return %c0_i32, %c0_i32_0, %arg0 : i32, i32, i32
  }
  func.func @transform_1(%arg0: i32, %arg1: memref<1xi32, #tpu.memory_space<smem>>, %arg2: memref<1xi32, #tpu.memory_space<smem>>) -> (i32, i32) {
    %c0_i32 = arith.constant 0 : i32
    %c0_i32_0 = arith.constant 0 : i32
    return %c0_i32, %arg0 : i32, i32
  }
  func.func @transform_2(%arg0: i32, %arg1: memref<1xi32, #tpu.memory_space<smem>>, %arg2: memref<1xi32, #tpu.memory_space<smem>>) -> (i32, i32) {
    %c0_i32 = arith.constant 0 : i32
    %c0_i32_0 = arith.constant 0 : i32
    return %c0_i32, %arg0 : i32, i32
  }
  func.func @transform_3(%arg0: i32, %arg1: memref<1xi32, #tpu.memory_space<smem>>, %arg2: memref<1xi32, #tpu.memory_space<smem>>) -> (i32, i32) {
    %c0_i32 = arith.constant 0 : i32
    %c0_i32_0 = arith.constant 0 : i32
    return %c0_i32, %arg0 : i32, i32
  }
  func.func @transform_4(%arg0: i32, %arg1: memref<1xi32, #tpu.memory_space<smem>>, %arg2: memref<1xi32, #tpu.memory_space<smem>>) -> (i32, i32) {
    %c0_i32 = arith.constant 0 : i32
    %c0_i32_0 = arith.constant 0 : i32
    %c0_i32_1 = arith.constant 0 : i32
    return %c0_i32, %c0_i32_0 : i32, i32
  }
  func.func @transform_5(%arg0: i32, %arg1: memref<1xi32, #tpu.memory_space<smem>>, %arg2: memref<1xi32, #tpu.memory_space<smem>>) -> (i32, i32) {
    %c0_i32 = arith.constant 0 : i32
    %c0_i32_0 = arith.constant 0 : i32
    %c0_i32_1 = arith.constant 0 : i32
    return %c0_i32, %c0_i32_0 : i32, i32
  }
  func.func @transform_6(%arg0: i32, %arg1: memref<1xi32, #tpu.memory_space<smem>>, %arg2: memref<1xi32, #tpu.memory_space<smem>>) -> (i32, i32) {
    %c0_i32 = arith.constant 0 : i32
    %c0_i32_0 = arith.constant 0 : i32
    %c0_i32_1 = arith.constant 0 : i32
    return %c0_i32, %c0_i32_0 : i32, i32
  }
  func.func @transform_7(%arg0: i32, %arg1: memref<1xi32, #tpu.memory_space<smem>>, %arg2: memref<1xi32, #tpu.memory_space<smem>>) -> (i32, i32) {
    %c0_i32 = arith.constant 0 : i32
    %c0_i32_0 = arith.constant 0 : i32
    %c0_i32_1 = arith.constant 0 : i32
    return %c0_i32, %c0_i32_0 : i32, i32
  }
  func.func @transform_8(%arg0: i32, %arg1: memref<1xi32, #tpu.memory_space<smem>>, %arg2: memref<1xi32, #tpu.memory_space<smem>>) -> (i32, i32, i32) {
    %c0_i32 = arith.constant 0 : i32
    %c0_i32_0 = arith.constant 0 : i32
    %c0_i32_1 = arith.constant 0 : i32
    return %arg0, %c0_i32, %c0_i32_0 : i32, i32, i32
  }
}

</mosaic_0001>

<bundles_post_ra>
// kernel: tpu_custom_call.1
= control target key start
LH: loop header
LB: loop body
LE: loop exit
PB: predicated region body
PF: predicated region fallthrough
CT: control target
= control target key end

     0   :  { %s845_s0 = inlined_call_operand.<no memory space> [shape: s32[1], index: 0, kind: input, shape index: {}]   ;;  %s846_s1 = inlined_call_operand.<no memory space> [shape: s32[1], index: 1, kind: input, shape index: {}]   ;;  %s847_s2 = inlined_call_operand.vmem [shape: f32[10,9,128], index: 2, kind: input, shape index: {}]   ;;  %s848_s3 = inlined_call_operand.vmem [shape: s32[10,128], index: 3, kind: input, shape index: {}]   ;;  %s849_s4 = inlined_call_operand.vmem [shape: f32[10,128], index: 4, kind: input, shape index: {}]   ;;  %s850_s5 = inlined_call_operand.vmem [shape: f32[1,128], index: 5, kind: input, shape index: {}]   ;;  %s851_s6 = inlined_call_operand.vmem [shape: f32[9,1], index: 6, kind: input, shape index: {}]   ;;  %s852_s7 = inlined_call_operand.vmem [shape: f32[9,9], index: 7, kind: input, shape index: {}]   ;;  %s853_s8 = inlined_call_operand.vmem [shape: f32[9,1], index: 8, kind: input, shape index: {}]   ;;  %s854_s9 = inlined_call_operand.vmem [shape: f32[9,1], index: 9, kind: input, shape index: {}]   ;;  %s855_s10 = inlined_call_operand.hbm [shape: f32[1,1,128], index: 10, kind: output, shape index: {}]  }
   0x1   :  { %v34_v0 = vld [vmem:[%s851_s6] sm:$0xff] }
   0x2   :  { %17 = vsyncpa [#allocation6], 0  ;;  %v564_v1 = vmov 0   ;;  %v35_v2 = vld [vmem:[%s851_s6 + $0x8] sm:$0x1]  ;;  %v54_v3 = vlaneseq  ;;  %v52_v7 = vld [vmem:[%s848_s3] sm:$0xff]  ;;  %p401_p0 = scmp.ge.s32.totalorder %s845_s0, %s846_s1 }
   0x3   :  { %464 = vset.pattern.permute.xlu0 %v564_v1  ;;  %v53_v5 = vld [vmem:[%s848_s3 + $0x8] sm:$0x3]  ;;  %vm61_vm1 = vcmask 1041408   ;;  %vm57_vm2 = vcmp.ne.s32.totalorder %v52_v7, 0  ;;  %v83_v11 = vld [vmem:[%s849_s4] sm:$0xff]  ;;  %v703_v46 = vmov 0.0  }
   0x4   :  { %38 = vperm.xlu0 %464, %v34_v0   ;;  %v55_v4 = vshrl.u32 %v54_v3, 7  ;;  %vm58_vm0 = vcmp.ne.s32.totalorder %v53_v5, 0  ;;  %v84_v8 = vld [vmem:[%s849_s4 + $0x8] sm:$0x3]  ;;  %v74_v10 = vsel %vm61_vm1, %v53_v5, 0  ;;  %v661_v36 = vld [vmem:[%s854_s9] sm:$0xff] }
   0x5   :  { %v85_v12 = vsel %vm61_vm1, %v84_v8, 0.0  ;;  %v75_v15 = vadd.s32 %v74_v10, %v52_v7  ;;  %v93_v35 = vld [vmem:[%s850_s5] sm:$0x1]  ;;  %v666_v37 = vld [vmem:[%s854_s9 + $0x8] sm:$0x1]  ;;  %v705_v47 = vmov 0.0  }
   0x6   :  { %v56_v6 = vadd.s32 8, %v55_v4  ;;  %v59_v13 = vsel %vm57_vm2, %v55_v4, 9  ;;  %v86_v16 = vadd.f32 %v85_v12, %v83_v11  ;;  %v671_v38 = vld [vmem:[%s853_s8] sm:$0xff]  ;;  %v681_v41 = vld [vmem:[%s853_s8 + $0x8] sm:$0x1] }
   0x7   :  { %v76_v18 = vrot.slane %v75_v15, 4  ;;  %v686_v42 = vld [vmem:[%s852_s7] sm:$0xff]  ;;  %v691_v43 = vld [vmem:[%s852_s7 + $0x8] sm:$0x1] }
   0x8   :  { %v60_v9 = vsel %vm58_vm0, %v56_v6, 9  ;;  %v87_v19 = vrot.slane %v86_v16, 4 }
   0x9   :  { %v62_v14 = vsel %vm61_vm1, %v60_v9, 2147483647  ;;  %v77_v21 = vadd.s32 %v76_v18, %v75_v15 }
   0xa   :  { %vm63_vm3 = vcmp.lt.s32.totalorder %v59_v13, %v62_v14  ;;  %v88_v22 = vadd.f32 %v87_v19, %v86_v16 }
   0xb   :  { %v64_v17 = vsel %vm63_vm3, %v59_v13, %v62_v14  ;;  %v78_v24 = vrot.slane %v77_v21, 2 }
   0xc   :  { %43 = vperm.xlu0 %464, %v35_v2   ;;  %v65_v20 = vrot.slane %v64_v17, 4  ;;  %v89_v25 = vrot.slane %v88_v22, 2 }
   0xd   :  { %v79_v27 = vadd.s32 %v78_v24, %v77_v21 }
   0xe   :  { %vm66_vm4 = vcmp.lt.s32.totalorder %v64_v17, %v65_v20  ;;  %v90_v28 = vadd.f32 %v89_v25, %v88_v22 }
   0xf   :  { %v67_v23 = vsel %vm66_vm4, %v64_v17, %v65_v20  ;;  %v80_v30 = vrot.slane %v79_v27, 1 }
  0x10   :  { %v68_v26 = vrot.slane %v67_v23, 2  ;;  %v91_v31 = vrot.slane %v90_v28, 1 }
  0x11   :  { %v653_v33 = vadd.s32 %v80_v30, %v79_v27 }
  0x12   :  { %vm69_vm5 = vcmp.lt.s32.totalorder %v67_v23, %v68_v26  ;;  %v92_v34 = vadd.f32 %v91_v31, %v90_v28 }
  0x13   :  { %v70_v29 = vsel %vm69_vm5, %v67_v23, %v68_v26  ;;  %vm82_vm7 = vcmp.gt.s32.totalorder %v653_v33, 0 }
  0x14   :  { %v71_v32 = vrot.slane %v70_v29, 1  ;;  %v676_v40 = vadd.f32 %v93_v35, %v92_v34 }
  0x16   :  { %vm72_vm6 = vcmp.lt.s32.totalorder %v70_v29, %v71_v32 }
  0x17   :  { %v673_v39 = vsel %vm72_vm6, %v70_v29, %v71_v32 }
  0x76   :  { %v693_v44 = vpop.permute.xlu0 %38 }
  0x7a   :  { %404 = sbr.rel (%p401_p0) target bundleno = 332 (0x14c), region = 55 }
  0x7e   :  { %v695_v45 = vpop.permute.xlu0 %43 }
  0x7f   :  { %v707_v48 = vmov 0.0   ;;  %v709_v49 = vmov 0.0  }
  0x80 LB: > { %v565_v50 = vmov 1   ;;  %v566_v51 = vmov 0   ;;  %v567_v52 = vmov 2   ;;  %v568_v53 = vmov 3   ;;  %s109_s21 = scalar_lea.vmem %s848_s3, %s554_s0  ;;  %s411_s22 = sshll.u32 %s554_s0, 4  ;;  %s554_s0 = sphi %s845_s0, %s100_s0   ;;  %v550_v49 = vphi %v709_v49, %v859_v49   ;;  %v546_v48 = vphi %v707_v48, %v858_v48  }
  0x81   : > { %466 = vset.pattern.permute.xlu1 %v565_v50  ;;  %465 = vset.pattern.permute.xlu0 %v566_v51  ;;  %v569_v54 = vmov 4   ;;  %v570_v55 = vmov 5   ;;  %v571_v56 = vmov 6   ;;  %v572_v57 = vmov 8   ;;  %s106_s4 = scalar_lea.vmem %s847_s2, %s411_s22 }
  0x82   : > { %152 = vperm.xlu1 %466, %v686_v42   ;;  %133 = vperm.xlu0 %465, %v686_v42   ;;  %v573_v58 = vmov 7   ;;  %vm116_vm8 = vcmask 1040384   ;;  %vm297_vm9 = vcmask 1042432   ;;  %vm299_vm10 = vcmask 1043456  }
  0x83   : > { %467 = vset.pattern.permute.xlu2 %v567_v52  ;;  %v117_v59 = vsel %vm116_vm8, %v546_v48, -inf  ;;  %vm301_vm11 = vcmask 1044480   ;;  %vm303_vm12 = vcmask 1045504   ;;  %vm305_vm13 = vcmask 1046528  }
  0x84   : > { %170 = vperm.xlu2 %467, %v686_v42   ;;  %v118_v60 = vmax.f32 %v550_v49, %v117_v59  ;;  %vm574_vm0 = vmmov 1  }
  0x86   : > { %v119_v61 = vrot.slane %v118_v60, 4 }
  0x88   : > { %v120_v62 = vmax.f32 %v118_v60, %v119_v61 }
  0x8a   : > { %156 = vperm.xlu1 %466, %v691_v43   ;;  %138 = vperm.xlu0 %465, %v691_v43   ;;  %v121_v63 = vrot.slane %v120_v62, 2 }
  0x8c   : > { %174 = vperm.xlu2 %467, %v691_v43   ;;  %v122_v0 = vmax.f32 %v120_v62, %v121_v63 }
  0x8e   : > { %v123_v2 = vrot.slane %v122_v0, 1 }
  0x90   : > { %v752_v4 = vmax.f32 %v122_v0, %v123_v2 }
  0x92   : > { %469 = vset.pattern.permute.xlu1 %v568_v53  ;;  %468 = vset.pattern.permute.xlu0 %v568_v53  ;;  %v126_v7 = vsub.f32 %v546_v48, %v752_v4  ;;  %v125_v8 = vsub.f32 %v550_v49, %v752_v4 }
  0x93   : > { %192 = vperm.xlu1 %469, %v691_v43   ;;  %188 = vperm.xlu0 %468, %v686_v42  }
  0x94   : > { %470 = vset.pattern.permute.xlu2 %v569_v54  ;;  %v129_v10 = vmul.f32 1.442695, %v126_v7  ;;  %v127_v11 = vmul.f32 1.442695, %v125_v8 }
  0x95   : > { %210 = vperm.xlu2 %470, %v691_v43  }
  0x96   : > { %483 = vpow2.f32 %v129_v10 }
  0x97   : > { %485 = vpow2.f32 %v127_v11 }
  0x9b   : > { %471 = vset.pattern.permute.xlu1 %v569_v54  ;;  %473 = vset.pattern.permute.xlu0 %v570_v55 }
  0x9c   : > { %206 = vperm.xlu1 %471, %v686_v42   ;;  %224 = vperm.xlu0 %473, %v686_v42   ;;  %v758_v15 = vpop.eup %483 }
  0x9d   : > { %472 = vset.pattern.permute.xlu2 %v570_v55  ;;  %v762_v20 = vpop.eup %485 }
  0x9e   : > { %228 = vperm.xlu2 %472, %v691_v43  }
  0xa4   : > { %474 = vset.pattern.permute.xlu1 %v571_v56  ;;  %478 = vset.pattern.permute.xlu0 %v572_v57 }
  0xa5   : > { %246 = vperm.xlu1 %474, %v691_v43   ;;  %282 = vperm.xlu0 %478, %v691_v43  }
  0xa6   : > { %475 = vset.pattern.permute.xlu2 %v571_v56 }
  0xa7   : > { %242 = vperm.xlu2 %475, %v686_v42  }
  0xad   : > { %476 = vset.pattern.permute.xlu1 %v573_v58  ;;  %482 = vset.pattern.permute.xlu0 %v566_v51 }
  0xae   : > { %264 = vperm.xlu1 %476, %v691_v43  }
  0xaf   : > { %477 = vset.pattern.permute.xlu2 %v573_v58 }
  0xb0   : > { %260 = vperm.xlu2 %477, %v686_v42  }
  0xb6   : > { %479 = vset.pattern.permute.xlu1 %v572_v57 }
  0xb7   : > { %278 = vperm.xlu1 %479, %v686_v42  }
  0xb8   : > { %480 = vset.pattern.permute.xlu2 %v566_v51 }
  0xb9   : > { %309 = vperm.xlu2 %480, %v671_v38  }
  0xbf   : > { %481 = vset.pattern.permute.xlu1 %v566_v51 }
  0xc0   : > { %314 = vperm.xlu1 %481, %v681_v41  }
  0xde   : > { %v171_v3 = vpop.permute.xlu2 %170 }
  0xdf   : > { %v177_v32 = vmul.f32 %v762_v20, %v171_v3 }
  0xe6   : > { %v175_v9 = vpop.permute.xlu2 %174 }
  0xe7   : > { %v178_v26 = vmul.f32 %v758_v15, %v175_v9 }
  0xe9   : > { %v179_v46 = vsel %vm116_vm8, %v178_v26, 0.0 }
  0xea   : > { %v180_v58 = vadd.f32 %v179_v46, %v177_v32 }
  0xec   : > { %v181_v3 = vrot.slane %v180_v58, 4 }
  0xef   : > { %v211_v14 = vpop.permute.xlu2 %210 }
  0xf0   : > { %v214_v27 = vmul.f32 %v758_v15, %v211_v14 }
  0xf2   : > { %v215_v47 = vsel %vm116_vm8, %v214_v27, 0.0 }
  0xf4   : > { %v153_v5 = vpop.permute.xlu1 %152  ;;  %v134_v6 = vpop.permute.xlu0 %133 }
  0xf5   : > { %v141_v21 = vmul.f32 %v762_v20, %v134_v6  ;;  %v159_v23 = vmul.f32 %v762_v20, %v153_v5 }
  0xf8   : > { %v229_v28 = vpop.permute.xlu2 %228 }
  0xf9   : > { %v232_v35 = vmul.f32 %v758_v15, %v229_v28 }
  0xfb   : > { %v233_v59 = vsel %vm116_vm8, %v232_v35, 0.0 }
  0xfc   : > { %v157_v12 = vpop.permute.xlu1 %156  ;;  %v139_v13 = vpop.permute.xlu0 %138 }
  0xfd   : > { %v160_v16 = vmul.f32 %v758_v15, %v157_v12  ;;  %v142_v17 = vmul.f32 %v758_v15, %v139_v13  ;;  %v182_v13 = vadd.f32 %v181_v3, %v180_v58 }
  0xff   : > { %v161_v22 = vsel %vm116_vm8, %v160_v16, 0.0  ;;  %v143_v24 = vsel %vm116_vm8, %v142_v17, 0.0 }
 0x100   : > { %v162_v29 = vadd.f32 %v161_v22, %v159_v23  ;;  %v144_v30 = vadd.f32 %v143_v24, %v141_v21  ;;  %v183_v23 = vrot.slane %v182_v13, 2 }
 0x101   : > { %v243_v62 = vpop.permute.xlu2 %242 }
 0x102   : > { %v163_v53 = vrot.slane %v162_v29, 4  ;;  %v145_v55 = vrot.slane %v144_v30, 4  ;;  %v249_v8 = vmul.f32 %v762_v20, %v243_v62  ;;  %v184_v35 = vadd.f32 %v183_v23, %v182_v13 }
 0x103   : > { %v111_v13 = vstv %s554_s0  ;;  %s100_s0 = sadd.s32 1, %s554_s0  }
 0x104   : > { %v164_v61 = vadd.f32 %v163_v53, %v162_v29  ;;  %v146_v63 = vadd.f32 %v145_v55, %v144_v30  ;;  %vm797_vm14 = vcmp.eq.s32.totalorder %v673_v39, %v111_v13  ;;  %p99_p1 = scmp.ge.s32.totalorder %s100_s0, %s846_s1 }
 0x105   : > { %v193_v18 = vpop.permute.xlu1 %192  ;;  %v189_v19 = vpop.permute.xlu0 %188  ;;  %vm114_vm2 = vmxor %vm797_vm14, %vm574_vm0 }
 0x106   : > { %v196_v25 = vmul.f32 %v758_v15, %v193_v18  ;;  %v195_v31 = vmul.f32 %v762_v20, %v189_v19  ;;  %v165_v6 = vrot.slane %v164_v61, 2  ;;  %v147_v9 = vrot.slane %v146_v63, 2 }
 0x108   : > { %v197_v34 = vsel %vm116_vm8, %v196_v25, 0.0  ;;  %v166_v17 = vadd.f32 %v165_v6, %v164_v61  ;;  %v148_v19 = vadd.f32 %v147_v9, %v146_v63 }
 0x109   : > { %v198_v56 = vadd.f32 %v197_v34, %v195_v31 }
 0x10a   : > { %v261_v26 = vpop.permute.xlu2 %260  ;;  %v167_v27 = vrot.slane %v166_v17, 1  ;;  %v149_v29 = vrot.slane %v148_v19, 1 }
 0x10b   : > { %v199_v0 = vrot.slane %v198_v56, 4  ;;  %v267_v34 = vmul.f32 %v762_v20, %v261_v26 }
 0x10c   : > { %v168_v53 = vadd.f32 %v167_v27, %v166_v17  ;;  %v150_v55 = vadd.f32 %v149_v29, %v148_v19 }
 0x10d   : > { %v200_v10 = vadd.f32 %v199_v0, %v198_v56 }
 0x10e   : > { %v207_v50 = vpop.permute.xlu1 %206  ;;  %v225_v52 = vpop.permute.xlu0 %224  ;;  %v295_v0 = vsel %vm116_vm8, %v150_v55, %v168_v53  ;;  %v107_v55 = vld [vmem:[%s106_s4] sm:$0xff] }
 0x10f   : > { %v213_v54 = vmul.f32 %v762_v20, %v207_v50  ;;  %v231_v57 = vmul.f32 %v762_v20, %v225_v52  ;;  %v201_v21 = vrot.slane %v200_v10, 2 }
 0x111   : > { %v216_v60 = vadd.f32 %v215_v47, %v213_v54  ;;  %v234_v2 = vadd.f32 %v233_v59, %v231_v57  ;;  %v202_v30 = vadd.f32 %v201_v21, %v200_v10  ;;  %v185_v59 = vrot.slane %v184_v35, 1 }
 0x113   : > { %v217_v5 = vrot.slane %v216_v60, 4  ;;  %v235_v11 = vrot.slane %v234_v2, 4  ;;  %v203_v56 = vrot.slane %v202_v30, 1  ;;  %v186_v6 = vadd.f32 %v185_v59, %v184_v35  ;;  %v310_v35 = vpop.permute.xlu2 %309 }
 0x114   : > { %v327_v59 = vadd.f32 %v107_v55, %v693_v44 }
 0x115   : > { %v218_v14 = vadd.f32 %v217_v5, %v216_v60  ;;  %v236_v22 = vadd.f32 %v235_v11, %v234_v2  ;;  %v204_v2 = vadd.f32 %v203_v56, %v202_v30 }
 0x117   : > { %v247_v7 = vpop.permute.xlu1 %246  ;;  %v219_v24 = vrot.slane %v218_v14, 2  ;;  %v237_v31 = vrot.slane %v236_v22, 2  ;;  %v283_v52 = vpop.permute.xlu0 %282 }
 0x118   : > { %v250_v12 = vmul.f32 %v758_v15, %v247_v7  ;;  %v286_v62 = vmul.f32 %v758_v15, %v283_v52 }
 0x119   : > { %v220_v46 = vadd.f32 %v219_v24, %v218_v14  ;;  %v238_v57 = vadd.f32 %v237_v31, %v236_v22  ;;  %v110_v24 = vld [vmem:[%s109_s21] sm:$0x1] }
 0x11a   : > { %v251_v16 = vsel %vm116_vm8, %v250_v12, 0.0  ;;  %v287_v9 = vsel %vm116_vm8, %v286_v62, 0.0  ;;  %vm113_vm15 = vcmp.ne.s32.totalorder %v110_v24, 0 }
 0x11b   : > { %v252_v18 = vadd.f32 %v251_v16, %v249_v8  ;;  %v221_v60 = vrot.slane %v220_v46, 1  ;;  %v239_v3 = vrot.slane %v238_v57, 1  ;;  %vm115_vm3 = vmand %vm113_vm15, %vm114_vm2 }
 0x11d   : > { %v253_v25 = vrot.slane %v252_v18, 4  ;;  %v222_v7 = vadd.f32 %v221_v60, %v220_v46  ;;  %v240_v16 = vadd.f32 %v239_v3, %v238_v57  ;;  %v331_v46 = vsel %vm115_vm3, 1, %v566_v51 }
 0x11f   : > { %v254_v28 = vadd.f32 %v253_v25, %v252_v18 }
 0x120   : > { %v265_v32 = vpop.permute.xlu1 %264 }
 0x121   : > { %v255_v47 = vrot.slane %v254_v28, 2  ;;  %v268_v50 = vmul.f32 %v758_v15, %v265_v32  ;;  %v296_v15 = vsel %vm61_vm1, %v295_v0, %v186_v6  ;;  %v108_v0 = vld [vmem:[%s106_s4 + $0x8] sm:$0x1] }
 0x122   : > { %v298_v14 = vsel %vm297_vm9, %v296_v15, %v204_v2 }
 0x123   : > { %v269_v54 = vsel %vm116_vm8, %v268_v50, 0.0  ;;  %v256_v61 = vadd.f32 %v255_v47, %v254_v28  ;;  %v300_v19 = vsel %vm299_vm10, %v298_v14, %v222_v7  ;;  %v317_v50 = vadd.f32 %v310_v35, %v752_v4 }
 0x124   : > { %v270_v58 = vadd.f32 %v269_v54, %v267_v34  ;;  %v302_v27 = vsel %vm301_vm11, %v300_v19, %v240_v16  ;;  %v332_v54 = vperm.slane %v331_v46, 0 }
 0x125   : > { %v257_v8 = vrot.slane %v256_v61, 1 }
 0x126   : > { %v271_v63 = vrot.slane %v270_v58, 4  ;;  %vm333_vm4 = vcmp.eq.s32.totalorder %v332_v54, 1 }
 0x127   : > { %v258_v21 = vadd.f32 %v257_v8, %v256_v61 }
 0x128   : > { %v272_v5 = vadd.f32 %v271_v63, %v270_v58 }
 0x129   : > { %v279_v10 = vpop.permute.xlu1 %278  ;;  %v304_v28 = vsel %vm303_vm12, %v302_v27, %v258_v21 }
 0x12a   : > { %v273_v11 = vrot.slane %v272_v5, 2  ;;  %v285_v12 = vmul.f32 %v762_v20, %v279_v10 }
 0x12c   : > { %v274_v17 = vadd.f32 %v273_v11, %v272_v5  ;;  %v288_v18 = vadd.f32 %v287_v9, %v285_v12  ;;  %v328_v5 = vadd.f32 %v108_v0, %v695_v45 }
 0x12e   : > { %v275_v22 = vrot.slane %v274_v17, 1  ;;  %v289_v23 = vrot.slane %v288_v18, 4 }
 0x130   : > { %v276_v25 = vadd.f32 %v275_v22, %v274_v17  ;;  %v290_v26 = vadd.f32 %v289_v23, %v288_v18 }
 0x132   : > { %v291_v29 = vrot.slane %v290_v26, 2  ;;  %v306_v30 = vsel %vm305_vm13, %v304_v28, %v276_v25  ;;  %v315_v58 = vpop.permute.xlu1 %314 }
 0x133   : > { %v319_v31 = vmax.f32 %v306_v30, 1e-37  ;;  %v318_v51 = vadd.f32 %v315_v58, %v752_v4 }
 0x134   : > { %v292_v32 = vadd.f32 %v291_v29, %v290_v26 }
 0x135   : > { %487 = vlog2.f32 %v319_v31 }
 0x136   : > { %v293_v34 = vrot.slane %v292_v32, 1 }
 0x138   : > { %v294_v47 = vadd.f32 %v293_v34, %v292_v32 }
 0x13a   : > { %v320_v52 = vmax.f32 %v294_v47, 1e-37 }
 0x13b   : > { %v488_v53 = vpop.eup %487 }
 0x13c   : > { %v322_v56 = vmul.f32 0.6931472, %v488_v53  ;;  %489 = vlog2.f32 %v320_v52 }
 0x13e   : > { %v325_v57 = vadd.f32 %v322_v56, %v317_v50 }
 0x140   : > { %v329_v60 = vadd.f32 %v325_v57, %v107_v55 }
 0x142   : > { %v490_v61 = vpop.eup %489  ;;  %v334_v62 = vsel %vm333_vm4, %v329_v60, %v550_v49 }
 0x143   : > { %v338_v63 = vsel %vm797_vm14, %v327_v59, %v334_v62   ;;  %v324_v2 = vmul.f32 0.6931472, %v490_v61 }
 0x144   : > { %v859_v49 = vmov %v338_v63  ;;  %v861_v47 = vmov (%p99_p1), %v338_v63 }
 0x145   : > { %v326_v3 = vadd.f32 %v324_v2, %v318_v51 }
 0x147   : > { %v330_v6 = vadd.f32 %v326_v3, %v108_v0  ;;  %102 = sbr.rel (!%p99_p1) target bundleno = 128 (0x80), region = 61 }
 0x149   : > { %v335_v7 = vsel %vm333_vm4, %v330_v6, %v546_v48 }
 0x14a   : > { %v339_v8 = vsel %vm797_vm14, %v328_v5, %v335_v7  }
 0x14b   : > { %v858_v48 = vmov %v339_v8  ;;  %v860_v46 = vmov (%p99_p1), %v339_v8 }
 0x14c PF:  { %491 = vset.pattern.permute.xlu0 %v564_v1  ;;  %vm352_vm5 = vcmask 1040384   ;;  %s575_s0 = smov [#allocation5]   ;;  %s388_s26 = sshll.u32 %s855_s10, 4  ;;  %v562_v47 = vphi %v705_v47, %v861_v47   ;;  %v558_v46 = vphi %v703_v46, %v860_v46   ;;  %s389_s26 = int_to_ptr.hbm [resolvable:$true] %s388_s26 }
 0x14d   :  { %347 = vperm.xlu0 %491, %v666_v37   ;;  %s386_s1 = sshll.u32 %s575_s0, 4  ;;  %s387_s1 = int_to_ptr.vmem [resolvable:$true] %s386_s1 }
 0x155   :  { %342 = vperm.xlu0 %491, %v661_v36  }
 0x1bf   :  { %v348_v49 = vpop.permute.xlu0 %347 }
 0x1c0   :  { %v351_v4 = vadd.f32 %v558_v46, %v348_v49 }
 0x1c2   :  { %v353_v39 = vsel %vm352_vm5, %v351_v4, -inf }
 0x1c7   :  { %v343_v9 = vpop.permute.xlu0 %342 }
 0x1c8   :  { %v350_v38 = vadd.f32 %v562_v47, %v343_v9 }
 0x1ca   :  { %v354_v41 = vmax.f32 %v350_v38, %v353_v39 }
 0x1cc   :  { %v355_v42 = vrot.slane %v354_v41, 4 }
 0x1ce   :  { %v356_v43 = vmax.f32 %v354_v41, %v355_v42 }
 0x1d0   :  { %v357_v44 = vrot.slane %v356_v43, 2 }
 0x1d2   :  { %v358_v45 = vmax.f32 %v356_v43, %v357_v44 }
 0x1d4   :  { %v359_v48 = vrot.slane %v358_v45, 1 }
 0x1d6   :  { %v360_v10 = vmax.f32 %v358_v45, %v359_v48 }
 0x1d8   :  { %v361_v11 = vsub.f32 %v350_v38, %v360_v10  ;;  %v362_v1 = vsub.f32 %v351_v4, %v360_v10 }
 0x1da   :  { %v363_v12 = vmul.f32 1.442695, %v361_v11  ;;  %v365_v37 = vmul.f32 1.442695, %v362_v1 }
 0x1dc   :  { %492 = vpow2.f32 %v363_v12 }
 0x1dd   :  { %494 = vpow2.f32 %v365_v37 }
 0x1e2   :  { %v493_v36 = vpop.eup %492 }
 0x1e3   :  { %v495_v15 = vpop.eup %494 }
 0x1e4   :  { %v367_v13 = vsel %vm352_vm5, %v495_v15, 0.0 }
 0x1e5   :  { %v368_v14 = vadd.f32 %v493_v36, %v367_v13 }
 0x1e7   :  { %v369_v16 = vrot.slane %v368_v14, 4 }
 0x1e9   :  { %v370_v17 = vadd.f32 %v369_v16, %v368_v14 }
 0x1eb   :  { %v371_v18 = vrot.slane %v370_v17, 2 }
 0x1ed   :  { %v372_v19 = vadd.f32 %v371_v18, %v370_v17 }
 0x1ef   :  { %v373_v21 = vrot.slane %v372_v19, 1 }
 0x1f1   :  { %v374_v22 = vadd.f32 %v373_v21, %v372_v19 }
 0x1f3   :  { %496 = vlog2.f32 %v374_v22 }
 0x1f9   :  { %v497_v23 = vpop.eup %496 }
 0x1fa   :  { %v376_v24 = vmul.f32 0.6931472, %v497_v23 }
 0x1fc   :  { %v377_v20 = vadd.f32 %v376_v24, %v360_v10 }
 0x1fe   :  { %v378_v25 = vsub.f32 %v377_v20, %v676_v40 }
 0x200   :  { %v379_v26 = vsel %vm82_vm7, %v378_v25, 0.0 }
 0x201   :  { %380 = vst [vmem:[#allocation5] sm:$0x1] %v379_v26 }
 0x202   :  { %391 = dma.vmem_to_hbm [thread:$0]  %s387_s1, 16, %s389_s26, [#allocation6]  }
 0x203   :  { %542 = dma.done.wait [#allocation6], 16  }
 0x204   :  { %543 = vsyncadd [#allocation6], 4294967280 }
 0x205   :  { %396 = vsyncpa [#allocation6], 1 }

</bundles_post_ra>
